<compile_context>
chip_gen: v7x
topology: tpu7x:2x2x1
jax: 0.10.0
libtpu: 0.0.40
codegen_flags: <defaults>
</compile_context>

<pallas_src>
import jax
import jax.numpy as jnp
from jax.experimental import pallas as pl
from jax.experimental.pallas import tpu as pltpu


def input_embedding_kernel(x_ref, w_ref, b_ref, o_ref):
    # x_ref: (tm, PE)   w_ref: (PE, PE) block-diag of W^T   b_ref: (1, PE) f32
    y = jnp.dot(x_ref[...], w_ref[...], preferred_element_type=jnp.float32)
    y = y + b_ref[...]                         # broadcast bias over rows (VALU, hidden)
    o_ref[...] = jax.nn.sigmoid(y).astype(o_ref.dtype)


def _round_up(n, m):
    return ((n + m - 1) // m) * m


def _default_pack_lanes():
    # 128-wide packing on v5e (4x128^2 MXU), 256-wide on v6e/v7x (2x256^2 MXU).
    try:
        kind = jax.devices()[0].device_kind.lower()
        if "v5 lite" in kind or "v5e" in kind or "v5litepod" in kind:
            return 128
    except Exception:
        pass
    return 256


def _choose_pack(E, pack_lanes):
    # Pack P rows into the lane axis so the packed width is a full vreg
    # multiple.  Falls back to no packing when E does not divide evenly.
    if E >= 128:
        return 1
    for lanes in (pack_lanes, 128):
        if lanes >= E and lanes % E == 0:
            return lanes // E
    return 1


def input_embedding(src, weight, bias, *, tm=1024, pack_lanes=None):
    """src: (..., E). weight: (E_out, E_in) PyTorch Linear layout. bias: (E,)."""
    E = src.shape[-1]
    lead = src.shape[:-1]
    x = src.reshape(-1, E)
    M = x.shape[0]

    if pack_lanes is None:
        pack_lanes = _default_pack_lanes()
    P = _choose_pack(E, pack_lanes)
    PE = P * E

    # Build the block-diagonal weight (PE, PE) and tiled bias (1, PE) once,
    # wrapper-side.  Each packed row [x_0 | x_1 | ... | x_{P-1}] times
    # blockdiag(W^T, ..., W^T) gives [x_0 @ W^T | ... | x_{P-1} @ W^T].
    w_t = weight.T.astype(src.dtype)                      # (E_in, E_out)
    if P > 1:
        w_big = jnp.kron(jnp.eye(P, dtype=src.dtype), w_t)   # (PE, PE)
    else:
        w_big = w_t
    b_big = jnp.tile(bias.astype(jnp.float32), P).reshape(1, PE)

    # Pad rows to a multiple of P, then pack into the lane axis (row-major
    # reinterpretation; padded rows are sliced off at the end).
    Mp = _round_up(M, P)
    if Mp != M:
        x = jnp.pad(x, ((0, Mp - M), (0, 0)))
    R = Mp // P
    xp = x.reshape(R, PE)

    # Row tile: as large as requested, but no larger than needed, and a
    # multiple of 8 sublanes.  cdiv + padding replaces the old divisibility
    # assert so large tiles work for any batch*seq.
    tm_eff = min(tm, _round_up(R, 8))
    n_tiles = pl.cdiv(R, tm_eff)
    Rpad = n_tiles * tm_eff
    if Rpad != R:
        xp = jnp.pad(xp, ((0, Rpad - R), (0, 0)))

    out = pl.pallas_call(
        input_embedding_kernel,
        out_shape=jax.ShapeDtypeStruct((Rpad, PE), src.dtype),
        grid_spec=pltpu.PrefetchScalarGridSpec(
            num_scalar_prefetch=0,
            grid=(n_tiles,),
            in_specs=[
                pl.BlockSpec((tm_eff, PE), lambda i: (i, 0)),  # streaming row tile
                pl.BlockSpec((PE, PE), lambda i: (0, 0)),      # resident weight
                pl.BlockSpec((1, PE), lambda i: (0, 0)),       # resident bias
            ],
            out_specs=pl.BlockSpec((tm_eff, PE), lambda i: (i, 0)),
        ),
        compiler_params=pltpu.CompilerParams(
            dimension_semantics=("parallel",),
        ),
    )(xp, w_big, b_big)

    # Unpack: drop padded packed rows, un-pack lanes back to (M, E), drop
    # padded token rows, restore leading dims.
    out = out[:R].reshape(Mp, E)[:M]
    return out.reshape(*lead, E)


def _ref_forward(src, weight, bias):
    # Pure-JAX reference of nn.Linear + Sigmoid (PyTorch: x @ W^T + b).
    return jax.nn.sigmoid(jnp.einsum("...i,oi->...o", src, weight) + bias)


if __name__ == "__main__":
    key = jax.random.PRNGKey(0)
    k_x, k_w, k_b, k_x2 = jax.random.split(key, 4)

    batch, seq, embed = 2, 8, 32          # small shapes implied by the module
    bound = 1.0 / (embed ** 0.5)
    weight = jax.random.uniform(k_w, (embed, embed), jnp.float32, -bound, bound)
    bias = jax.random.uniform(k_b, (embed,), jnp.float32, -bound, bound)
    src = jax.random.normal(k_x, (batch, seq, embed), jnp.float32)

    out = input_embedding(src, weight, bias)
    out = jax.block_until_ready(out)
    ref = _ref_forward(src, weight, bias)
    assert out.shape == (batch, seq, embed)
    assert jnp.allclose(out, ref, atol=1e-5, rtol=1e-5), "mismatch vs reference"

    # Ragged row count: exercises the cdiv + padding path (no divisibility assert).
    src2 = jax.random.normal(k_x2, (3, 5, embed), jnp.float32)
    out2 = jax.block_until_ready(input_embedding(src2, weight, bias))
    ref2 = _ref_forward(src2, weight, bias)
    assert out2.shape == (3, 5, embed)
    assert jnp.allclose(out2, ref2, atol=1e-5, rtol=1e-5), "mismatch vs reference (ragged)"

    print("KERNEL_OK")
</pallas_src>

<mosaic_0001>
module attributes {stable_mosaic.version = 11 : i64} {
  func.func @input_embedding_kernel(%arg0: i32, %arg1: memref<8x256xf32, #tpu.memory_space<vmem>>, %arg2: memref<256x256xf32, #tpu.memory_space<vmem>>, %arg3: memref<1x256xf32, #tpu.memory_space<vmem>>, %arg4: memref<8x256xf32, #tpu.memory_space<vmem>>) attributes {dimension_semantics = [#tpu.dimension_semantics<parallel>], iteration_bounds = array<i64: 1>, scalar_prefetch = 0 : i64, scratch_operands = 0 : i64, tpu.core_type = #tpu.core_type<tc>, window_params = [{transform_indices = @transform_0, window_bounds = array<i64: 8, 256>}, {pipeline_mode = #tpu.pipeline_mode<synchronous>, transform_indices = @transform_1, window_bounds = array<i64: 256, 256>}, {pipeline_mode = #tpu.pipeline_mode<synchronous>, transform_indices = @transform_2, window_bounds = array<i64: 1, 256>}, {transform_indices = @transform_3, window_bounds = array<i64: 8, 256>}]} {
    %c0 = arith.constant 0 : index
    %c0_0 = arith.constant 0 : index
    %0 = vector.load %arg1[%c0, %c0_0] : memref<8x256xf32, #tpu.memory_space<vmem>>, vector<8x256xf32>
    %c0_1 = arith.constant 0 : index
    %c0_2 = arith.constant 0 : index
    %1 = vector.load %arg2[%c0_1, %c0_2] : memref<256x256xf32, #tpu.memory_space<vmem>>, vector<256x256xf32>
    %cst = arith.constant dense<0.000000e+00> : vector<8x256xf32>
    %2 = tpu.matmul %0, %1, %cst {dimension_numbers = #tpu.dot_dimension_numbers<[1], [0], [0], [1], [0, 0, 1, 1], [], []>} : vector<8x256xf32>, vector<256x256xf32>, vector<8x256xf32> -> vector<8x256xf32>
    %c0_3 = arith.constant 0 : index
    %c0_4 = arith.constant 0 : index
    %3 = vector.load %arg3[%c0_3, %c0_4] : memref<1x256xf32, #tpu.memory_space<vmem>>, vector<1x256xf32>
    %4 = vector.broadcast %3 : vector<1x256xf32> to vector<8x256xf32>
    %5 = arith.addf %2, %4 : vector<8x256xf32>
    %6 = arith.negf %5 : vector<8x256xf32>
    %7 = math.exp %6 : vector<8x256xf32>
    %cst_5 = arith.constant 1.000000e+00 : f32
    %8 = vector.broadcast %cst_5 : f32 to vector<8x256xf32>
    %9 = arith.addf %8, %7 : vector<8x256xf32>
    %10 = arith.divf %8, %9 : vector<8x256xf32>
    %c0_6 = arith.constant 0 : index
    %c0_7 = arith.constant 0 : index
    %11 = vector.load %arg4[%c0_6, %c0_7] : memref<8x256xf32, #tpu.memory_space<vmem>>, vector<8x256xf32>
    tpu.vector_store %arg4[%c0_6, %c0_7], %10 {strides = array<i32>} : memref<8x256xf32, #tpu.memory_space<vmem>>, vector<8x256xf32>,
    return
  }
  func.func @transform_0(%arg0: i32) -> (i32, i32) {
    %c0_i32 = arith.constant 0 : i32
    %c0_i32_0 = arith.constant 0 : i32
    return %arg0, %c0_i32 : i32, i32
  }
  func.func @transform_1(%arg0: i32) -> (i32, i32) {
    %c0_i32 = arith.constant 0 : i32
    %c0_i32_0 = arith.constant 0 : i32
    %c0_i32_1 = arith.constant 0 : i32
    return %c0_i32, %c0_i32_0 : i32, i32
  }
  func.func @transform_2(%arg0: i32) -> (i32, i32) {
    %c0_i32 = arith.constant 0 : i32
    %c0_i32_0 = arith.constant 0 : i32
    %c0_i32_1 = arith.constant 0 : i32
    return %c0_i32, %c0_i32_0 : i32, i32
  }
  func.func @transform_3(%arg0: i32) -> (i32, i32) {
    %c0_i32 = arith.constant 0 : i32
    %c0_i32_0 = arith.constant 0 : i32
    return %arg0, %c0_i32 : i32, i32
  }
}

</mosaic_0001>

<bundles_post_ra>
// kernel: tpu_custom_call.1
= control target key start
LH: loop header
LB: loop body
LE: loop exit
PB: predicated region body
PF: predicated region fallthrough
CT: control target
= control target key end

     0   :  { %8 = vsyncpa [#allocation3], 0  ;;  %s442_s0 = inlined_call_operand.hbm [shape: f32[8,256], index: 0, kind: input, shape index: {}]   ;;  %s443_s1 = inlined_call_operand.hbm [shape: f32[256,256], index: 1, kind: input, shape index: {}]   ;;  %s444_s2 = inlined_call_operand.vmem [shape: f32[1,256], index: 2, kind: input, shape index: {}]   ;;  %s445_s3 = inlined_call_operand.hbm [shape: f32[8,256], index: 3, kind: output, shape index: {}]  }
   0x1   :  { %9 = vsyncpa [#allocation6], 0 }
   0x2   :  { %10 = vsyncpa [#allocation4], 0  ;;  %s371_s12 = smov [#allocation2]   ;;  %s372_s14 = smov [#allocation5]  }
   0x3   :  { %s17_s13 = sshll.u32 %s371_s12, 4  ;;  %s26_s15 = sshll.u32 %s372_s14, 4  ;;  %s18_s13 = int_to_ptr.vmem [resolvable:$true] %s17_s13  ;;  %s396_s15 = int_to_ptr.vmem [resolvable:$true] %s26_s15 }
   0x4   :  { %s299_s18 = scalar_lea.hbm %s442_s0, 256 }
   0x5   :  { %p300_p0 = scmp.ne.s32.totalorder %s442_s0, %s299_s18  ;;  %p303_p1 = scmp.lt.u32.totalorder %s299_s18, %s442_s0 }
   0x7   :  { %p305_p2 = pnand %p303_p1, %p300_p0 }
   0x9   :  { %308 = shalt.err (!%p305_p2)
}
   0xa   :  { %s309_s23 = scalar_lea.vmem %s18_s13, 256  ;;  %p314_p4 = scmp.lt.s32.totalorder %s18_s13, %s18_s13 }
   0xb   :  { %p310_p3 = scmp.ne.s32.totalorder %s18_s13, %s309_s23  ;;  %p315_p5 = scmp.lt.s32.totalorder %s309_s23, %s309_s23 }
   0xd   :  { %p316_p6 = por %p315_p5, %p314_p4 }
   0xf   :  { %p317_p7 = pnand %p316_p6, %p310_p3 }
  0x11   :  { %320 = shalt.err (!%p317_p7)
}
  0x12   :  { %20 = dma.hbm_to_vmem [thread:$0]  %s442_s0, 256, %s18_s13, [#allocation3]  }
  0x13   :  { %s321_s28 = scalar_lea.hbm %s443_s1, 8192 }
  0x14   :  { %p322_p8 = scmp.ne.s32.totalorder %s443_s1, %s321_s28  ;;  %p325_p9 = scmp.lt.u32.totalorder %s321_s28, %s443_s1 }
  0x16   :  { %p327_p10 = pnand %p325_p9, %p322_p8 }
  0x18   :  { %330 = shalt.err (!%p327_p10)
}
  0x19   :  { %s331_s6 = scalar_lea.vmem %s396_s15, 8192  ;;  %p336_p12 = scmp.lt.s32.totalorder %s396_s15, %s396_s15 }
  0x1a   :  { %p332_p11 = scmp.ne.s32.totalorder %s396_s15, %s331_s6  ;;  %p337_p13 = scmp.lt.s32.totalorder %s331_s6, %s331_s6 }
  0x1c   :  { %p338_p0 = por %p337_p13, %p336_p12 }
  0x1e   :  { %p339_p1 = pnand %p338_p0, %p332_p11 }
  0x20   :  { %342 = shalt.err (!%p339_p1)
}
  0x21   :  { %s373_s0 = smov 256   ;;  %s374_s7 = smov 16  }
  0x22   :  { %32 = dma.hbm_to_vmem [thread:$0]  %s443_s1, 8192, %s396_s15, [#allocation6], %s373_s0, %s373_s0, %s374_s7  }
  0x23   :  { %365 = dma.done.wait [#allocation3], 256  }
  0x24   :  { %366 = vsyncadd [#allocation3], 4294967040 }
  0x25   :  { %367 = dma.done.wait [#allocation6], 8192  }
  0x26   :  { %368 = vsyncadd [#allocation6], 4294959104  ;;  %v44_v0 = vld [vmem:[#allocation5 + $0x8] sm:$0xff]  ;;  %v46_v1 = vld [vmem:[#allocation5 + $0x18] sm:$0xff]  ;;  %s375_s11 = smov [#allocation7]  }
  0x27   :  { %v43_v2 = vld [vmem:[#allocation5] sm:$0xff]  ;;  %v222_v3 = vpack.c.bf16 %v46_v1, %v44_v0  ;;  %v45_v4 = vld [vmem:[#allocation5 + $0x10] sm:$0xff]  ;;  %v48_v5 = vld [vmem:[#allocation5 + $0x28] sm:$0xff]  ;;  %s210_s12 = sshll.u32 %s375_s11, 4  ;;  %s211_s12 = int_to_ptr.vmem [resolvable:$true] %s210_s12 }
  0x28   :  { %v50_v6 = vld [vmem:[#allocation5 + $0x38] sm:$0xff]  ;;  %v224_v7 = vpack.c.bf16 %v45_v4, %v43_v2  ;;  %v47_v9 = vld [vmem:[#allocation5 + $0x20] sm:$0xff]  ;;  %v49_v10 = vld [vmem:[#allocation5 + $0x30] sm:$0xff]  ;;  %p348_p3 = scmp.lt.s32.totalorder %s211_s12, %s211_s12 }
  0x29   :  { %v226_v8 = vpack.c.bf16 %v50_v6, %v48_v5  ;;  %v52_v11 = vld [vmem:[#allocation5 + $0x48] sm:$0xff]  ;;  %223 = vmatprep.subr.bf16.mxu0 %v222_v3  ;;  %v54_v12 = vld [vmem:[#allocation5 + $0x58] sm:$0xff]  ;;  %v228_v13 = vpack.c.bf16 %v49_v10, %v47_v9  ;;  %v51_v15 = vld [vmem:[#allocation5 + $0x40] sm:$0xff] }
  0x2a   :  { %225 = vmatpush1.bf16.msra.mxu0 %v224_v7  ;;  %v230_v14 = vpack.c.bf16 %v54_v12, %v52_v11  ;;  %v53_v16 = vld [vmem:[#allocation5 + $0x50] sm:$0xff]  ;;  %v56_v17 = vld [vmem:[#allocation5 + $0x68] sm:$0xff]  ;;  %v58_v18 = vld [vmem:[#allocation5 + $0x78] sm:$0xff] }
  0x2b   :  { %227 = vmatprep.subr.bf16.mxu0 %v226_v8  ;;  %v232_v19 = vpack.c.bf16 %v53_v16, %v51_v15  ;;  %v234_v20 = vpack.c.bf16 %v58_v18, %v56_v17  ;;  %v55_v21 = vld [vmem:[#allocation5 + $0x60] sm:$0xff]  ;;  %v57_v22 = vld [vmem:[#allocation5 + $0x70] sm:$0xff]  ;;  %v60_v23 = vld [vmem:[#allocation5 + $0x88] sm:$0xff] }
  0x2c   :  { %v62_v24 = vld [vmem:[#allocation5 + $0x98] sm:$0xff]  ;;  %v236_v25 = vpack.c.bf16 %v57_v22, %v55_v21  ;;  %v59_v27 = vld [vmem:[#allocation5 + $0x80] sm:$0xff]  ;;  %v61_v28 = vld [vmem:[#allocation5 + $0x90] sm:$0xff] }
  0x2d   :  { %v238_v26 = vpack.c.bf16 %v62_v24, %v60_v23  ;;  %v64_v29 = vld [vmem:[#allocation5 + $0xa8] sm:$0xff]  ;;  %v66_v30 = vld [vmem:[#allocation5 + $0xb8] sm:$0xff]  ;;  %v240_v31 = vpack.c.bf16 %v61_v28, %v59_v27  ;;  %v63_v33 = vld [vmem:[#allocation5 + $0xa0] sm:$0xff] }
  0x2e   :  { %229 = vmatpush1.bf16.msra.mxu0 %v228_v13  ;;  %v242_v32 = vpack.c.bf16 %v66_v30, %v64_v29  ;;  %v65_v34 = vld [vmem:[#allocation5 + $0xb0] sm:$0xff]  ;;  %v68_v35 = vld [vmem:[#allocation5 + $0xc8] sm:$0xff]  ;;  %v70_v36 = vld [vmem:[#allocation5 + $0xd8] sm:$0xff] }
  0x2f   :  { %231 = vmatprep.subr.bf16.mxu0 %v230_v14  ;;  %v244_v37 = vpack.c.bf16 %v65_v34, %v63_v33  ;;  %v246_v38 = vpack.c.bf16 %v70_v36, %v68_v35  ;;  %v67_v39 = vld [vmem:[#allocation5 + $0xc0] sm:$0xff]  ;;  %v69_v40 = vld [vmem:[#allocation5 + $0xd0] sm:$0xff]  ;;  %v42_v41 = vld [vmem:[#allocation2 + $0x8] sm:$0xff]  ;;  %v109_v34 = vlaneseq }
  0x30   :  { %v72_v42 = vld [vmem:[#allocation5 + $0xe8] sm:$0xff]  ;;  %v74_v43 = vld [vmem:[#allocation5 + $0xf8] sm:$0xff]  ;;  %183 = vmatprep.mubr.f32.mxu0 %v42_v41  ;;  %v248_v44 = vpack.c.bf16 %v69_v40, %v67_v39  ;;  %v71_v46 = vld [vmem:[#allocation5 + $0xe0] sm:$0xff] }
  0x31   :  { %v250_v45 = vpack.c.bf16 %v74_v43, %v72_v42  ;;  %v73_v47 = vld [vmem:[#allocation5 + $0xf0] sm:$0xff]  ;;  %v76_v48 = vld [vmem:[#allocation5 + $0x108] sm:$0xff]  ;;  %v78_v49 = vld [vmem:[#allocation5 + $0x118] sm:$0xff]  ;;  %v110_v35 = vshrl.u32 %v109_v34, 7 }
  0x32   :  { %233 = vmatpush1.bf16.msra.mxu0 %v232_v19  ;;  %v252_v50 = vpack.c.bf16 %v73_v47, %v71_v46  ;;  %v254_v51 = vpack.c.bf16 %v78_v49, %v76_v48  ;;  %v75_v52 = vld [vmem:[#allocation5 + $0x100] sm:$0xff]  ;;  %v77_v53 = vld [vmem:[#allocation5 + $0x110] sm:$0xff]  ;;  %v80_v54 = vld [vmem:[#allocation5 + $0x128] sm:$0xff] }
  0x33   :  { %235 = vmatprep.subr.bf16.mxu0 %v234_v20  ;;  %v82_v55 = vld [vmem:[#allocation5 + $0x138] sm:$0xff]  ;;  %v256_v56 = vpack.c.bf16 %v77_v53, %v75_v52  ;;  %v79_v58 = vld [vmem:[#allocation5 + $0x120] sm:$0xff]  ;;  %v81_v59 = vld [vmem:[#allocation5 + $0x130] sm:$0xff]  ;;  %v111_v36 = vsub.s32 0, %v110_v35 }
  0x34   :  { %v258_v57 = vpack.c.bf16 %v82_v55, %v80_v54  ;;  %v84_v60 = vld [vmem:[#allocation5 + $0x148] sm:$0xff]  ;;  %v86_v61 = vld [vmem:[#allocation5 + $0x158] sm:$0xff]  ;;  %v260_v62 = vpack.c.bf16 %v81_v59, %v79_v58  ;;  %v83_v0 = vld [vmem:[#allocation5 + $0x140] sm:$0xff] }
  0x35   :  { %v262_v63 = vpack.c.bf16 %v86_v61, %v84_v60  ;;  %v85_v1 = vld [vmem:[#allocation5 + $0x150] sm:$0xff]  ;;  %v88_v2 = vld [vmem:[#allocation5 + $0x168] sm:$0xff]  ;;  %v90_v3 = vld [vmem:[#allocation5 + $0x178] sm:$0xff] }
  0x36   :  { %237 = vmatpush1.bf16.msra.mxu0 %v236_v25  ;;  %v264_v4 = vpack.c.bf16 %v85_v1, %v83_v0  ;;  %v266_v5 = vpack.c.bf16 %v90_v3, %v88_v2  ;;  %v87_v6 = vld [vmem:[#allocation5 + $0x160] sm:$0xff]  ;;  %v89_v7 = vld [vmem:[#allocation5 + $0x170] sm:$0xff]  ;;  %v92_v8 = vld [vmem:[#allocation5 + $0x188] sm:$0xff] }
  0x37   :  { %239 = vmatprep.subr.bf16.mxu0 %v238_v26  ;;  %v94_v9 = vld [vmem:[#allocation5 + $0x198] sm:$0xff]  ;;  %v268_v10 = vpack.c.bf16 %v89_v7, %v87_v6  ;;  %v91_v12 = vld [vmem:[#allocation5 + $0x180] sm:$0xff]  ;;  %v93_v13 = vld [vmem:[#allocation5 + $0x190] sm:$0xff] }
  0x38   :  { %v270_v11 = vpack.c.bf16 %v94_v9, %v92_v8  ;;  %v96_v14 = vld [vmem:[#allocation5 + $0x1a8] sm:$0xff]  ;;  %v98_v15 = vld [vmem:[#allocation5 + $0x1b8] sm:$0xff]  ;;  %v272_v16 = vpack.c.bf16 %v93_v13, %v91_v12  ;;  %v95_v18 = vld [vmem:[#allocation5 + $0x1a0] sm:$0xff] }
  0x39   :  { %v274_v17 = vpack.c.bf16 %v98_v15, %v96_v14  ;;  %v97_v19 = vld [vmem:[#allocation5 + $0x1b0] sm:$0xff]  ;;  %v100_v20 = vld [vmem:[#allocation5 + $0x1c8] sm:$0xff]  ;;  %v102_v21 = vld [vmem:[#allocation5 + $0x1d8] sm:$0xff] }
  0x3a   :  { %241 = vmatpush1.bf16.msra.mxu0 %v240_v31  ;;  %v276_v22 = vpack.c.bf16 %v97_v19, %v95_v18  ;;  %v278_v23 = vpack.c.bf16 %v102_v21, %v100_v20  ;;  %v99_v24 = vld [vmem:[#allocation5 + $0x1c0] sm:$0xff]  ;;  %v101_v25 = vld [vmem:[#allocation5 + $0x1d0] sm:$0xff]  ;;  %v104_v26 = vld [vmem:[#allocation5 + $0x1e8] sm:$0xff] }
  0x3b   :  { %243 = vmatprep.subr.bf16.mxu0 %v242_v32  ;;  %v106_v27 = vld [vmem:[#allocation5 + $0x1f8] sm:$0xff]  ;;  %v280_v28 = vpack.c.bf16 %v101_v25, %v99_v24  ;;  %v103_v30 = vld [vmem:[#allocation5 + $0x1e0] sm:$0xff]  ;;  %v105_v31 = vld [vmem:[#allocation5 + $0x1f0] sm:$0xff] }
  0x3c   :  { %v282_v29 = vpack.c.bf16 %v106_v27, %v104_v26  ;;  %v284_v32 = vpack.c.bf16 %v105_v31, %v103_v30  ;;  %v41_v33 = vld [vmem:[#allocation2] sm:$0xff] }
  0x3e   :  { %245 = vmatpush1.bf16.msra.mxu0 %v244_v37  ;;  %v107_v37 = vld [vmem:[%s444_s2] sm:$0x3]  ;;  %s343_s2 = scalar_lea.vmem %s211_s12, 256 }
  0x3f   :  { %247 = vmatprep.subr.bf16.mxu0 %v246_v38  ;;  %v115_v38 = vsub.s32 1, %v110_v35  ;;  %v112_v39 = vrot.slane %v107_v37, %v111_v36  ;;  %p344_p2 = scmp.ne.s32.totalorder %s211_s12, %s343_s2  ;;  %p349_p4 = scmp.lt.s32.totalorder %s343_s2, %s343_s2 }
  0x41   :  { %v116_v40 = vrot.slane %v107_v37, %v115_v38  ;;  %p350_p5 = por %p349_p4, %p348_p3 }
  0x42   :  { %249 = vmatpush1.bf16.msra.mxu0 %v248_v44 }
  0x43   :  { %251 = vmatprep.subr.bf16.mxu0 %v250_v45  ;;  %p351_p6 = pnand %p350_p5, %p344_p2 }
  0x46   :  { %253 = vmatpush1.bf16.msra.mxu0 %v252_v50 }
  0x47   :  { %255 = vmatprep.subr.bf16.mxu0 %v254_v51 }
  0x4a   :  { %257 = vmatpush1.bf16.msra.mxu0 %v256_v56 }
  0x4b   :  { %259 = vmatprep.subr.bf16.mxu0 %v258_v57 }
  0x4e   :  { %261 = vmatpush1.bf16.msra.mxu0 %v260_v62 }
  0x4f   :  { %263 = vmatprep.subr.bf16.mxu0 %v262_v63 }
  0x52   :  { %265 = vmatpush1.bf16.msra.mxu0 %v264_v4 }
  0x53   :  { %267 = vmatprep.subr.bf16.mxu0 %v266_v5 }
  0x56   :  { %269 = vmatpush1.bf16.msra.mxu0 %v268_v10 }
  0x57   :  { %271 = vmatprep.subr.bf16.mxu0 %v270_v11 }
  0x5a   :  { %273 = vmatpush1.bf16.msra.mxu0 %v272_v16 }
  0x5b   :  { %275 = vmatprep.subr.bf16.mxu0 %v274_v17 }
  0x5e   :  { %277 = vmatpush1.bf16.msra.mxu0 %v276_v22 }
  0x5f   :  { %279 = vmatprep.subr.bf16.mxu0 %v278_v23 }
  0x62   :  { %281 = vmatpush1.bf16.msra.mxu0 %v280_v28 }
  0x63   :  { %283 = vmatprep.subr.bf16.mxu0 %v282_v29 }
  0x66   :  { %285 = vmatpush1.bf16.msra.mxu0 %v284_v32 }
  0x69   :  { %184 = vmatmul.mubr.f32.vlgmr.msra.gmra.mrb[0].mxu0 %v41_v33 }
 0x13c   :  { %v185_v41 = vpop.f32.mrb[0].mxu0 }
 0x13d   :  { %v186_v42 = vadd.f32 %v185_v41, %v112_v39  ;;  %v187_v43 = vpop.f32.mrb[1].mxu0 }
 0x13e   :  { %v188_v44 = vadd.f32 %v187_v43, %v116_v40 }
 0x13f   :  { %v220_v45 = vmul.f32 -1.442695, %v186_v42 }
 0x140   :  { %v221_v46 = vmul.f32 -1.442695, %v188_v44 }
 0x141   :  { %291 = vpow2.f32 %v220_v45 }
 0x142   :  { %293 = vpow2.f32 %v221_v46 }
 0x14b   :  { %v292_v47 = vpop.eup %291 }
 0x14c   :  { %v294_v48 = vpop.eup %293  ;;  %v196_v49 = vadd.f32 1.0, %v292_v47 }
 0x14d   :  { %v197_v50 = vadd.f32 1.0, %v294_v48 }
 0x14e   :  { %295 = vrcp.f32 %v196_v49 }
 0x14f   :  { %297 = vrcp.f32 %v197_v50 }
 0x158   :  { %v296_v51 = vpop.eup %295 }
 0x159   :  { %v298_v52 = vpop.eup %297  ;;  %202 = vst [vmem:[#allocation7] sm:$0xff] %v296_v51 }
 0x15a   :  { %203 = vst [vmem:[#allocation7 + $0x8] sm:$0xff] %v298_v52 }
 0x15b   :  { %354 = shalt.err (!%p351_p6)
}
 0x15c   :  { %s355_s15 = scalar_lea.hbm %s445_s3, 256 }
 0x15d   :  { %p356_p7 = scmp.ne.s32.totalorder %s445_s3, %s355_s15  ;;  %p359_p8 = scmp.lt.u32.totalorder %s355_s15, %s445_s3 }
 0x15f   :  { %p361_p9 = pnand %p359_p8, %p356_p7 }
 0x161   :  { %364 = shalt.err (!%p361_p9)
}
 0x162   :  { %213 = dma.vmem_to_hbm [thread:$0]  %s211_s12, 256, %s445_s3, [#allocation4]  }
 0x163   :  { %369 = dma.done.wait [#allocation4], 256  }
 0x164   :  { %370 = vsyncadd [#allocation4], 4294967040 }
 0x165   :  { %217 = vsyncpa [#allocation3], 1 }
 0x166   :  { %218 = vsyncpa [#allocation6], 1 }
 0x167   :  { %219 = vsyncpa [#allocation4], 1 }

</bundles_post_ra>
